<compile_context>
chip_gen: v6e
topology: v6e:2x2x1
jax: 0.10.0
libtpu: 0.0.40
codegen_flags: <defaults>
</compile_context>

<pallas_src>
import jax
import jax.numpy as jnp
from jax.experimental import pallas as pl
from jax.experimental.pallas import tpu as pltpu

BN_EPS = 1e-5
LANE = 128


def _round_up(n, m):
    return (n + m - 1) // m * m


def _pad2(a, rows, cols):
    return jnp.pad(a, ((0, rows - a.shape[0]), (0, cols - a.shape[1])))


def dqn_kernel(x_ref,
               w1_ref, g1_ref, be1_ref,
               w2_ref, g2_ref, be2_ref,
               w3_ref, g3_ref, be3_ref,
               w4_ref, b4_ref,
               out_ref):
    x = x_ref[...]

    def bn_relu(h, gamma, beta):
        # BatchNorm1d, training-mode per-batch stats, biased variance,
        # two-pass (torch-faithful), folded affine.
        mu = jnp.mean(h, axis=0, keepdims=True)              # (1, N)
        d = h - mu
        var = jnp.mean(d * d, axis=0, keepdims=True)         # (1, N)
        s = gamma * jax.lax.rsqrt(var + BN_EPS)              # EUP rsqrt
        return jnp.maximum(d * s + beta, 0.0)

    def mm(a, w_ref):
        # bf16 MXU matmul, f32 accumulation.
        return jnp.dot(a.astype(jnp.bfloat16), w_ref[...],
                       preferred_element_type=jnp.float32)

    # fc1 -> bn1 -> relu   (bias cancelled by BN; dropout1: identity)
    h = bn_relu(mm(x, w1_ref), g1_ref[...], be1_ref[...])
    # fc2 -> bn2 -> relu   (bias cancelled by BN; dropout2: identity)
    h = bn_relu(mm(h, w2_ref), g2_ref[...], be2_ref[...])
    # fc3 -> bn3 -> relu   (bias cancelled by BN; dropout3: identity)
    h = bn_relu(mm(h, w3_ref), g3_ref[...], be3_ref[...])
    # fc4 (bias kept)
    out_ref[...] = mm(h, w4_ref) + b4_ref[...]


def prepare_dqn_params(params):
    """One-time pad/cast of the torch-layout params.

    Call once per parameter update; reuse the result for every forward call.
    Only output/lane (N) dims are padded to 128; the w1 contraction dim keeps
    the real input size (x is fed unpadded).  b1/b2/b3 are dropped: a bias
    immediately before BatchNorm is cancelled by the mean subtraction.
    """
    (w1, _b1, g1, be1, w2, _b2, g2, be2, w3, _b3, g3, be3, w4, b4) = params
    in_dim, h2 = w1.shape
    hid = w3.shape[1]
    out_dim = w4.shape[1]
    h2_p = _round_up(h2, LANE)
    hid_p = _round_up(hid, LANE)
    out_p = _round_up(out_dim, LANE)

    ops = (
        _pad2(w1, in_dim, h2_p).astype(jnp.bfloat16),   # K unpadded
        _pad2(g1, 1, h2_p), _pad2(be1, 1, h2_p),
        _pad2(w2, h2_p, h2_p).astype(jnp.bfloat16),
        _pad2(g2, 1, h2_p), _pad2(be2, 1, h2_p),
        _pad2(w3, h2_p, hid_p).astype(jnp.bfloat16),
        _pad2(g3, 1, hid_p), _pad2(be3, 1, hid_p),
        _pad2(w4, hid_p, out_p).astype(jnp.bfloat16),
        _pad2(b4, 1, out_p),
    )
    ops = tuple(jax.block_until_ready(o) for o in ops)
    return {"ops": ops, "in_dim": in_dim, "h2_p": h2_p, "hid_p": hid_p,
            "out_dim": out_dim, "out_p": out_p}


def dqn_forward(x, prep):
    """x: (batch, input_size) f32, unpadded. prep: output of prepare_dqn_params."""
    batch, in_dim = x.shape
    assert in_dim == prep["in_dim"]
    h2_p, hid_p = prep["h2_p"], prep["hid_p"]
    out_dim, out_p = prep["out_dim"], prep["out_p"]

    operands = (x,) + prep["ops"]

    flops = 2 * batch * (in_dim * h2_p + h2_p * h2_p + h2_p * hid_p
                         + hid_p * out_p)
    transcendentals = 2 * h2_p + hid_p          # one rsqrt per BN feature col
    bytes_accessed = (sum(int(a.size) * a.dtype.itemsize for a in operands)
                      + batch * out_p * 4)

    vmem_spec = pl.BlockSpec(memory_space=pltpu.MemorySpace.VMEM)

    out_padded = pl.pallas_call(
        dqn_kernel,
        out_shape=jax.ShapeDtypeStruct((batch, out_p), jnp.float32),
        in_specs=[vmem_spec] * len(operands),
        out_specs=vmem_spec,
        cost_estimate=pl.CostEstimate(
            flops=flops,
            transcendentals=transcendentals,
            bytes_accessed=bytes_accessed),
    )(*operands)

    return out_padded[:, :out_dim]


def init_dqn_params(key, input_size, hidden_size, output_size):
    """Deterministic init mimicking torch defaults (U(-1/sqrt(fan_in), ...))."""
    h2 = hidden_size * 2

    def linear(k, fan_in, fan_out):
        kw, kb = jax.random.split(k)
        bound = 1.0 / jnp.sqrt(fan_in)
        w = jax.random.uniform(kw, (fan_in, fan_out), jnp.float32, -bound, bound)
        b = jax.random.uniform(kb, (1, fan_out), jnp.float32, -bound, bound)
        return w, b

    def bn(dim):
        return jnp.ones((1, dim), jnp.float32), jnp.zeros((1, dim), jnp.float32)

    k1, k2, k3, k4 = jax.random.split(key, 4)
    w1, b1 = linear(k1, input_size, h2)
    g1, be1 = bn(h2)
    w2, b2 = linear(k2, h2, h2)
    g2, be2 = bn(h2)
    w3, b3 = linear(k3, h2, hidden_size)
    g3, be3 = bn(hidden_size)
    w4, b4 = linear(k4, hidden_size, output_size)
    return (w1, b1, g1, be1, w2, b2, g2, be2, w3, b3, g3, be3, w4, b4)


def dqn_reference(x, params):
    """Torch-faithful math (biases included, two-pass variance) at the same
    bf16-matmul / f32-accumulate precision the kernel uses on the MXU."""
    (w1, b1, g1, be1, w2, b2, g2, be2, w3, b3, g3, be3, w4, b4) = params

    def mm(a, w):
        return jnp.dot(a.astype(jnp.bfloat16), w.astype(jnp.bfloat16),
                       preferred_element_type=jnp.float32)

    def bn_relu(h, g, be):
        mu = jnp.mean(h, axis=0, keepdims=True)
        var = jnp.mean((h - mu) ** 2, axis=0, keepdims=True)
        return jnp.maximum((h - mu) / jnp.sqrt(var + BN_EPS) * g + be, 0.0)

    h = bn_relu(mm(x, w1) + b1, g1, be1)
    h = bn_relu(mm(h, w2) + b2, g2, be2)
    h = bn_relu(mm(h, w3) + b3, g3, be3)
    return mm(h, w4) + b4


if __name__ == "__main__":
    batch, input_size, hidden_size, output_size = 8, 16, 32, 4

    key = jax.random.PRNGKey(0)
    kx, kp = jax.random.split(key)
    x = jax.random.normal(kx, (batch, input_size), jnp.float32)
    params = init_dqn_params(kp, input_size, hidden_size, output_size)

    prep = prepare_dqn_params(params)   # one-time pad/cast (amortized)
    out = dqn_forward(x, prep)
    out = jax.block_until_ready(out)

    ref = dqn_reference(x, params)
    assert out.shape == (batch, output_size)
    # Tolerance covers bf16 rounding / reduction-order differences between the
    # fused folded-BN kernel and the unfolded torch-faithful reference.
    assert jnp.allclose(out, ref, atol=2e-2, rtol=2e-2), (
        float(jnp.max(jnp.abs(out - ref))))

    print("KERNEL_OK")
</pallas_src>

<mosaic_0001>
module attributes {stable_mosaic.version = 11 : i64} {
  func.func @dqn_kernel(%arg0: memref<8x16xf32, #tpu.memory_space<vmem>>, %arg1: memref<16x128xbf16, #tpu.memory_space<vmem>>, %arg2: memref<1x128xf32, #tpu.memory_space<vmem>>, %arg3: memref<1x128xf32, #tpu.memory_space<vmem>>, %arg4: memref<128x128xbf16, #tpu.memory_space<vmem>>, %arg5: memref<1x128xf32, #tpu.memory_space<vmem>>, %arg6: memref<1x128xf32, #tpu.memory_space<vmem>>, %arg7: memref<128x128xbf16, #tpu.memory_space<vmem>>, %arg8: memref<1x128xf32, #tpu.memory_space<vmem>>, %arg9: memref<1x128xf32, #tpu.memory_space<vmem>>, %arg10: memref<128x128xbf16, #tpu.memory_space<vmem>>, %arg11: memref<1x128xf32, #tpu.memory_space<vmem>>, %arg12: memref<8x128xf32, #tpu.memory_space<vmem>>) attributes {dimension_semantics = [], scalar_prefetch = 0 : i64, scratch_operands = 0 : i64, tpu.core_type = #tpu.core_type<tc>} {
    %c0 = arith.constant 0 : index
    %c0_0 = arith.constant 0 : index
    %0 = vector.load %arg0[%c0, %c0_0] : memref<8x16xf32, #tpu.memory_space<vmem>>, vector<8x16xf32>
    %1 = arith.truncf %0 : vector<8x16xf32> to vector<8x16xbf16>
    %c0_1 = arith.constant 0 : index
    %c0_2 = arith.constant 0 : index
    %2 = vector.load %arg1[%c0_1, %c0_2] : memref<16x128xbf16, #tpu.memory_space<vmem>>, vector<16x128xbf16>
    %cst = arith.constant dense<0.000000e+00> : vector<8x128xf32>
    %3 = tpu.matmul %1, %2, %cst {dimension_numbers = #tpu.dot_dimension_numbers<[1], [0], [0], [1], [0, 0, 1, 1], [], []>} : vector<8x16xbf16>, vector<16x128xbf16>, vector<8x128xf32> -> vector<8x128xf32>
    %c0_3 = arith.constant 0 : index
    %c0_4 = arith.constant 0 : index
    %4 = vector.load %arg2[%c0_3, %c0_4] : memref<1x128xf32, #tpu.memory_space<vmem>>, vector<1x128xf32>
    %c0_5 = arith.constant 0 : index
    %c0_6 = arith.constant 0 : index
    %5 = vector.load %arg3[%c0_5, %c0_6] : memref<1x128xf32, #tpu.memory_space<vmem>>, vector<1x128xf32>
    %cst_7 = arith.constant dense<0.000000e+00> : vector<128xf32>
    %6 = vector.multi_reduction <add>, %3, %cst_7 [0] : vector<8x128xf32> to vector<128xf32>
    %7 = vector.shape_cast %6 : vector<128xf32> to vector<1x128xf32>
    %cst_8 = arith.constant 8.000000e+00 : f32
    %8 = vector.broadcast %cst_8 : f32 to vector<1x128xf32>
    %9 = arith.divf %7, %8 : vector<1x128xf32>
    %10 = vector.broadcast %9 : vector<1x128xf32> to vector<8x128xf32>
    %11 = arith.subf %3, %10 : vector<8x128xf32>
    %12 = arith.mulf %11, %11 : vector<8x128xf32>
    %cst_9 = arith.constant dense<0.000000e+00> : vector<128xf32>
    %13 = vector.multi_reduction <add>, %12, %cst_9 [0] : vector<8x128xf32> to vector<128xf32>
    %14 = vector.shape_cast %13 : vector<128xf32> to vector<1x128xf32>
    %cst_10 = arith.constant 8.000000e+00 : f32
    %15 = vector.broadcast %cst_10 : f32 to vector<1x128xf32>
    %16 = arith.divf %14, %15 : vector<1x128xf32>
    %cst_11 = arith.constant 9.99999974E-6 : f32
    %17 = vector.broadcast %cst_11 : f32 to vector<1x128xf32>
    %18 = arith.addf %16, %17 : vector<1x128xf32>
    %19 = math.rsqrt %18 : vector<1x128xf32>
    %20 = arith.mulf %4, %19 : vector<1x128xf32>
    %21 = vector.broadcast %20 : vector<1x128xf32> to vector<8x128xf32>
    %22 = arith.mulf %11, %21 : vector<8x128xf32>
    %23 = vector.broadcast %5 : vector<1x128xf32> to vector<8x128xf32>
    %24 = arith.addf %22, %23 : vector<8x128xf32>
    %cst_12 = arith.constant 0.000000e+00 : f32
    %25 = vector.broadcast %cst_12 : f32 to vector<8x128xf32>
    %26 = arith.maximumf %24, %25 : vector<8x128xf32>
    %27 = arith.truncf %26 : vector<8x128xf32> to vector<8x128xbf16>
    %c0_13 = arith.constant 0 : index
    %c0_14 = arith.constant 0 : index
    %28 = vector.load %arg4[%c0_13, %c0_14] : memref<128x128xbf16, #tpu.memory_space<vmem>>, vector<128x128xbf16>
    %cst_15 = arith.constant dense<0.000000e+00> : vector<8x128xf32>
    %29 = tpu.matmul %27, %28, %cst_15 {dimension_numbers = #tpu.dot_dimension_numbers<[1], [0], [0], [1], [0, 0, 1, 1], [], []>} : vector<8x128xbf16>, vector<128x128xbf16>, vector<8x128xf32> -> vector<8x128xf32>
    %c0_16 = arith.constant 0 : index
    %c0_17 = arith.constant 0 : index
    %30 = vector.load %arg5[%c0_16, %c0_17] : memref<1x128xf32, #tpu.memory_space<vmem>>, vector<1x128xf32>
    %c0_18 = arith.constant 0 : index
    %c0_19 = arith.constant 0 : index
    %31 = vector.load %arg6[%c0_18, %c0_19] : memref<1x128xf32, #tpu.memory_space<vmem>>, vector<1x128xf32>
    %cst_20 = arith.constant dense<0.000000e+00> : vector<128xf32>
    %32 = vector.multi_reduction <add>, %29, %cst_20 [0] : vector<8x128xf32> to vector<128xf32>
    %33 = vector.shape_cast %32 : vector<128xf32> to vector<1x128xf32>
    %cst_21 = arith.constant 8.000000e+00 : f32
    %34 = vector.broadcast %cst_21 : f32 to vector<1x128xf32>
    %35 = arith.divf %33, %34 : vector<1x128xf32>
    %36 = vector.broadcast %35 : vector<1x128xf32> to vector<8x128xf32>
    %37 = arith.subf %29, %36 : vector<8x128xf32>
    %38 = arith.mulf %37, %37 : vector<8x128xf32>
    %cst_22 = arith.constant dense<0.000000e+00> : vector<128xf32>
    %39 = vector.multi_reduction <add>, %38, %cst_22 [0] : vector<8x128xf32> to vector<128xf32>
    %40 = vector.shape_cast %39 : vector<128xf32> to vector<1x128xf32>
    %cst_23 = arith.constant 8.000000e+00 : f32
    %41 = vector.broadcast %cst_23 : f32 to vector<1x128xf32>
    %42 = arith.divf %40, %41 : vector<1x128xf32>
    %cst_24 = arith.constant 9.99999974E-6 : f32
    %43 = vector.broadcast %cst_24 : f32 to vector<1x128xf32>
    %44 = arith.addf %42, %43 : vector<1x128xf32>
    %45 = math.rsqrt %44 : vector<1x128xf32>
    %46 = arith.mulf %30, %45 : vector<1x128xf32>
    %47 = vector.broadcast %46 : vector<1x128xf32> to vector<8x128xf32>
    %48 = arith.mulf %37, %47 : vector<8x128xf32>
    %49 = vector.broadcast %31 : vector<1x128xf32> to vector<8x128xf32>
    %50 = arith.addf %48, %49 : vector<8x128xf32>
    %cst_25 = arith.constant 0.000000e+00 : f32
    %51 = vector.broadcast %cst_25 : f32 to vector<8x128xf32>
    %52 = arith.maximumf %50, %51 : vector<8x128xf32>
    %53 = arith.truncf %52 : vector<8x128xf32> to vector<8x128xbf16>
    %c0_26 = arith.constant 0 : index
    %c0_27 = arith.constant 0 : index
    %54 = vector.load %arg7[%c0_26, %c0_27] : memref<128x128xbf16, #tpu.memory_space<vmem>>, vector<128x128xbf16>
    %cst_28 = arith.constant dense<0.000000e+00> : vector<8x128xf32>
    %55 = tpu.matmul %53, %54, %cst_28 {dimension_numbers = #tpu.dot_dimension_numbers<[1], [0], [0], [1], [0, 0, 1, 1], [], []>} : vector<8x128xbf16>, vector<128x128xbf16>, vector<8x128xf32> -> vector<8x128xf32>
    %c0_29 = arith.constant 0 : index
    %c0_30 = arith.constant 0 : index
    %56 = vector.load %arg8[%c0_29, %c0_30] : memref<1x128xf32, #tpu.memory_space<vmem>>, vector<1x128xf32>
    %c0_31 = arith.constant 0 : index
    %c0_32 = arith.constant 0 : index
    %57 = vector.load %arg9[%c0_31, %c0_32] : memref<1x128xf32, #tpu.memory_space<vmem>>, vector<1x128xf32>
    %cst_33 = arith.constant dense<0.000000e+00> : vector<128xf32>
    %58 = vector.multi_reduction <add>, %55, %cst_33 [0] : vector<8x128xf32> to vector<128xf32>
    %59 = vector.shape_cast %58 : vector<128xf32> to vector<1x128xf32>
    %cst_34 = arith.constant 8.000000e+00 : f32
    %60 = vector.broadcast %cst_34 : f32 to vector<1x128xf32>
    %61 = arith.divf %59, %60 : vector<1x128xf32>
    %62 = vector.broadcast %61 : vector<1x128xf32> to vector<8x128xf32>
    %63 = arith.subf %55, %62 : vector<8x128xf32>
    %64 = arith.mulf %63, %63 : vector<8x128xf32>
    %cst_35 = arith.constant dense<0.000000e+00> : vector<128xf32>
    %65 = vector.multi_reduction <add>, %64, %cst_35 [0] : vector<8x128xf32> to vector<128xf32>
    %66 = vector.shape_cast %65 : vector<128xf32> to vector<1x128xf32>
    %cst_36 = arith.constant 8.000000e+00 : f32
    %67 = vector.broadcast %cst_36 : f32 to vector<1x128xf32>
    %68 = arith.divf %66, %67 : vector<1x128xf32>
    %cst_37 = arith.constant 9.99999974E-6 : f32
    %69 = vector.broadcast %cst_37 : f32 to vector<1x128xf32>
    %70 = arith.addf %68, %69 : vector<1x128xf32>
    %71 = math.rsqrt %70 : vector<1x128xf32>
    %72 = arith.mulf %56, %71 : vector<1x128xf32>
    %73 = vector.broadcast %72 : vector<1x128xf32> to vector<8x128xf32>
    %74 = arith.mulf %63, %73 : vector<8x128xf32>
    %75 = vector.broadcast %57 : vector<1x128xf32> to vector<8x128xf32>
    %76 = arith.addf %74, %75 : vector<8x128xf32>
    %cst_38 = arith.constant 0.000000e+00 : f32
    %77 = vector.broadcast %cst_38 : f32 to vector<8x128xf32>
    %78 = arith.maximumf %76, %77 : vector<8x128xf32>
    %79 = arith.truncf %78 : vector<8x128xf32> to vector<8x128xbf16>
    %c0_39 = arith.constant 0 : index
    %c0_40 = arith.constant 0 : index
    %80 = vector.load %arg10[%c0_39, %c0_40] : memref<128x128xbf16, #tpu.memory_space<vmem>>, vector<128x128xbf16>
    %cst_41 = arith.constant dense<0.000000e+00> : vector<8x128xf32>
    %81 = tpu.matmul %79, %80, %cst_41 {dimension_numbers = #tpu.dot_dimension_numbers<[1], [0], [0], [1], [0, 0, 1, 1], [], []>} : vector<8x128xbf16>, vector<128x128xbf16>, vector<8x128xf32> -> vector<8x128xf32>
    %c0_42 = arith.constant 0 : index
    %c0_43 = arith.constant 0 : index
    %82 = vector.load %arg11[%c0_42, %c0_43] : memref<1x128xf32, #tpu.memory_space<vmem>>, vector<1x128xf32>
    %83 = vector.broadcast %82 : vector<1x128xf32> to vector<8x128xf32>
    %84 = arith.addf %81, %83 : vector<8x128xf32>
    %c0_44 = arith.constant 0 : index
    %c0_45 = arith.constant 0 : index
    %85 = vector.load %arg12[%c0_44, %c0_45] : memref<8x128xf32, #tpu.memory_space<vmem>>, vector<8x128xf32>
    tpu.vector_store %arg12[%c0_44, %c0_45], %84 {strides = array<i32>} : memref<8x128xf32, #tpu.memory_space<vmem>>, vector<8x128xf32>,
    return
  }
}

</mosaic_0001>

<bundles_post_ra>
// kernel: tpu_custom_call.1
= control target key start
LH: loop header
LB: loop body
LE: loop exit
PB: predicated region body
PF: predicated region fallthrough
CT: control target
= control target key end

     0   :  { %17 = vsyncpa [#allocation3], 0  ;;  %s1070_s0 = inlined_call_operand.hbm [shape: f32[8,16], index: 0, kind: input, shape index: {}]   ;;  %s1071_s1 = inlined_call_operand.hbm [shape: bf16[16,128], index: 1, kind: input, shape index: {}]   ;;  %s1072_s2 = inlined_call_operand.vmem [shape: f32[1,128], index: 2, kind: input, shape index: {}]   ;;  %s1073_s3 = inlined_call_operand.vmem [shape: f32[1,128], index: 3, kind: input, shape index: {}]   ;;  %s1074_s4 = inlined_call_operand.hbm [shape: bf16[128,128], index: 4, kind: input, shape index: {}]   ;;  %s1075_s5 = inlined_call_operand.vmem [shape: f32[1,128], index: 5, kind: input, shape index: {}]   ;;  %s1076_s6 = inlined_call_operand.vmem [shape: f32[1,128], index: 6, kind: input, shape index: {}]   ;;  %s1077_s7 = inlined_call_operand.hbm [shape: bf16[128,128], index: 7, kind: input, shape index: {}]   ;;  %s1078_s8 = inlined_call_operand.vmem [shape: f32[1,128], index: 8, kind: input, shape index: {}]   ;;  %s1079_s9 = inlined_call_operand.vmem [shape: f32[1,128], index: 9, kind: input, shape index: {}]   ;;  %s1080_s10 = inlined_call_operand.hbm [shape: bf16[128,128], index: 10, kind: input, shape index: {}]   ;;  %s1081_s11 = inlined_call_operand.vmem [shape: f32[1,128], index: 11, kind: input, shape index: {}]   ;;  %s1082_s12 = inlined_call_operand.hbm [shape: f32[8,128], index: 12, kind: output, shape index: {}]  }
   0x1   :  { %18 = vsyncpa [#allocation6], 0 }
   0x2   :  { %19 = vsyncpa [#allocation9], 0 }
   0x3   :  { %20 = vsyncpa [#allocation4], 0  ;;  %s906_s21 = smov [#allocation5]  }
   0x4   :  { %s36_s22 = sshll.u32 %s906_s21, 4  ;;  %s37_s22 = int_to_ptr.vmem [resolvable:$true] %s36_s22 }
   0x5   :  { %s786_s23 = scalar_lea.vmem %s37_s22, 128  ;;  %p791_p1 = scmp.lt.s32.totalorder %s37_s22, %s37_s22 }
   0x6   :  { %p787_p0 = scmp.ne.s32.totalorder %s37_s22, %s786_s23  ;;  %p792_p2 = scmp.lt.s32.totalorder %s786_s23, %s786_s23 }
   0x8   :  { %p793_p3 = por %p792_p2, %p791_p1 }
   0xa   :  { %p794_p4 = pnand %p793_p3, %p787_p0 }
   0xc   :  { %797 = shalt.err (!%p794_p4)
}
   0xd   :  { %s907_s24 = smov 64   ;;  %s908_s25 = smov 4  }
   0xe   :  { %42 = dma.hbm_to_vmem [thread:$0]  %s1071_s1, 128, %s37_s22, [#allocation6], %s907_s24, %s907_s24, %s908_s25  }
   0xf   :  { %s909_s28 = smov [#allocation8]   ;;  %s910_s30 = smov [#allocation2]  }
  0x10   :  { %s68_s29 = sshll.u32 %s909_s28, 4  ;;  %s27_s13 = sshll.u32 %s910_s30, 4  ;;  %s69_s29 = int_to_ptr.vmem [resolvable:$true] %s68_s29  ;;  %s28_s13 = int_to_ptr.vmem [resolvable:$true] %s27_s13 }
  0x11   :  { %s806_s14 = scalar_lea.vmem %s69_s29, 1024  ;;  %p811_p6 = scmp.lt.s32.totalorder %s69_s29, %s69_s29 }
  0x12   :  { %p807_p5 = scmp.ne.s32.totalorder %s69_s29, %s806_s14  ;;  %p812_p7 = scmp.lt.s32.totalorder %s806_s14, %s806_s14 }
  0x14   :  { %p813_p8 = por %p812_p7, %p811_p6 }
  0x16   :  { %p814_p9 = pnand %p813_p8, %p807_p5 }
  0x18   :  { %817 = shalt.err (!%p814_p9)
}
  0x19   :  { %74 = dma.hbm_to_vmem [thread:$0]  %s1077_s7, 1024, %s69_s29, [#allocation9], %s907_s24, %s907_s24, %s908_s25  }
  0x1a   :  { %s826_s1 = scalar_lea.vmem %s28_s13, 128  ;;  %p831_p11 = scmp.lt.s32.totalorder %s28_s13, %s28_s13 }
  0x1b   :  { %p827_p10 = scmp.ne.s32.totalorder %s28_s13, %s826_s1  ;;  %p832_p12 = scmp.lt.s32.totalorder %s826_s1, %s826_s1 }
  0x1d   :  { %p833_p13 = por %p832_p12, %p831_p11 }
  0x1f   :  { %p834_p0 = pnand %p833_p13, %p827_p10 }
  0x21   :  { %837 = shalt.err (!%p834_p0)
}
  0x22   :  { %30 = dma.hbm_to_vmem [thread:$0]  %s1070_s0, 128, %s28_s13, [#allocation3]  }
  0x23   :  { %s911_s19 = smov [#allocation7]   ;;  %s912_s21 = smov [#allocation10]  }
  0x24   :  { %s52_s20 = sshll.u32 %s911_s19, 4  ;;  %s84_s22 = sshll.u32 %s912_s21, 4  ;;  %s53_s20 = int_to_ptr.vmem [resolvable:$true] %s52_s20  ;;  %s85_s22 = int_to_ptr.vmem [resolvable:$true] %s84_s22 }
  0x25   :  { %s846_s23 = scalar_lea.vmem %s53_s20, 1024  ;;  %p851_p2 = scmp.lt.s32.totalorder %s53_s20, %s53_s20 }
  0x26   :  { %p847_p1 = scmp.ne.s32.totalorder %s53_s20, %s846_s23  ;;  %p852_p3 = scmp.lt.s32.totalorder %s846_s23, %s846_s23 }
  0x28   :  { %p853_p4 = por %p852_p3, %p851_p2 }
  0x2a   :  { %p854_p5 = pnand %p853_p4, %p847_p1 }
  0x2c   :  { %857 = shalt.err (!%p854_p5)
}
  0x2d   :  { %58 = dma.hbm_to_vmem [thread:$0]  %s1074_s4, 1024, %s53_s20, [#allocation6], %s907_s24, %s907_s24, %s908_s25  }
  0x2e   :  { %s866_s0 = scalar_lea.vmem %s85_s22, 1024  ;;  %p871_p7 = scmp.lt.s32.totalorder %s85_s22, %s85_s22 }
  0x2f   :  { %p867_p6 = scmp.ne.s32.totalorder %s85_s22, %s866_s0  ;;  %p872_p8 = scmp.lt.s32.totalorder %s866_s0, %s866_s0 }
  0x31   :  { %p873_p9 = por %p872_p8, %p871_p7 }
  0x33   :  { %p874_p10 = pnand %p873_p9, %p867_p6 }
  0x35   :  { %877 = shalt.err (!%p874_p10)
}
  0x36   :  { %90 = dma.hbm_to_vmem [thread:$0]  %s1080_s10, 1024, %s85_s22, [#allocation9], %s907_s24, %s907_s24, %s908_s25  }
  0x37   :  { %898 = dma.done.wait [#allocation3], 128  }
  0x38   :  { %899 = vsyncadd [#allocation3], 4294967168 }
  0x39   :  { %900 = dma.done.wait [#allocation6], 1152  }
  0x3a   :  { %901 = vsyncadd [#allocation6], 4294966144 }
  0x3b   :  { %902 = dma.done.wait [#allocation9], 2048  }
  0x3c   :  { %903 = vsyncadd [#allocation9], 4294965248  ;;  %v913_v0 = vmov 0.0   ;;  %vm914_vm0 = vmmov 0   ;;  %v747_v1 = vld [vmem:[#allocation5] sm:$0xff]   ;;  %v109_v2 = vld [vmem:[#allocation2] sm:$0xff]  ;;  %v186_v33 = vlaneseq }
  0x3d   :  { %671 = vmatprep.subr.bf16.mxu0 %v913_v0  ;;  %673 = vmatprep.mubr.msk.bf16.mxu0 %vm914_vm0, %v913_v0  ;;  %vm119_vm1 = vcmask 130048   ;;  %v110_v3 = vpack.c.bf16 %v109_v2, %v109_v2  ;;  %v748_v4 = vld [vmem:[#allocation7 + $0x38] sm:$0xff]   ;;  %v749_v5 = vld [vmem:[#allocation7 + $0x30] sm:$0xff]   ;;  %v750_v6 = vld [vmem:[#allocation7 + $0x28] sm:$0xff]   ;;  %s915_s1 = smov [#allocation11]  }
  0x3e   :  { %677 = vmatprep.subr.bf16.mxu1 %v913_v0  ;;  %693 = vmatprep.mubr.msk.bf16.mxu1 %vm914_vm0, %v913_v0  ;;  %v751_v7 = vld [vmem:[#allocation7 + $0x20] sm:$0xff]   ;;  %v752_v8 = vld [vmem:[#allocation7 + $0x18] sm:$0xff]   ;;  %v753_v9 = vld [vmem:[#allocation7 + $0x10] sm:$0xff]   ;;  %v187_v34 = vshrl.u32 %v186_v33, 7  ;;  %s601_s17 = sshll.u32 %s915_s1, 4  ;;  %s602_s17 = int_to_ptr.vmem [resolvable:$true] %s601_s17 }
  0x3f   :  { %672 = vmatpush3.bf16.msra.mxu0 %v747_v1  ;;  %678 = vmatpush3.bf16.msra.mxu1 %v748_v4  ;;  %v754_v10 = vld [vmem:[#allocation7 + $0x8] sm:$0xff]   ;;  %v755_v11 = vld [vmem:[#allocation7] sm:$0xff]   ;;  %v163_v35 = vld [vmem:[%s1072_s2] sm:$0x1]  ;;  %p883_p12 = scmp.lt.s32.totalorder %s602_s17, %s602_s17 }
  0x40   :  { %697 = vmatprep.subr.bf16.mxu0 %v913_v0  ;;  %679 = vmatprep.subr.bf16.mxu1 %v913_v0  ;;  %v1028_v36 = vsub.s32 0, %v187_v34  ;;  %v614_v40 = vld [vmem:[%s1073_s3] ss:$0 sm:$0xff]  ;;  %v756_v45 = vld [vmem:[#allocation8 + $0x38] sm:$0xff]   ;;  %v758_v47 = vld [vmem:[#allocation8 + $0x28] sm:$0xff]  }
  0x41   :  { %v757_v46 = vld [vmem:[#allocation8 + $0x30] sm:$0xff]   ;;  %v759_v48 = vld [vmem:[#allocation8 + $0x20] sm:$0xff]   ;;  %v760_v49 = vld [vmem:[#allocation8 + $0x18] sm:$0xff]  }
  0x42   :  { %674 = vmatmul.mubr.msk.bf16.vlgmr.msra.gmra.mxu0 %vm119_vm1, %v110_v3  ;;  %v761_v50 = vld [vmem:[#allocation8 + $0x10] sm:$0xff]   ;;  %v762_v51 = vld [vmem:[#allocation8 + $0x8] sm:$0xff]   ;;  %v763_v52 = vld [vmem:[#allocation8] sm:$0xff]  }
  0x43   :  { %713 = vmatprep.mubr.msk.bf16.mxu0 %vm914_vm0, %v913_v0  ;;  %680 = vmatpush3.bf16.msra.mxu1 %v749_v5 }
  0x44   :  { %681 = vmatprep.subr.bf16.mxu1 %v913_v0  ;;  %698 = vmatpush3.bf16.msra.mxu0 %v756_v45 }
  0x45   :  { %699 = vmatprep.subr.bf16.mxu0 %v913_v0 }
  0x47   :  { %682 = vmatpush3.bf16.msra.mxu1 %v750_v6 }
  0x48   :  { %683 = vmatprep.subr.bf16.mxu1 %v913_v0  ;;  %700 = vmatpush3.bf16.msra.mxu0 %v757_v46 }
  0x49   :  { %701 = vmatprep.subr.bf16.mxu0 %v913_v0 }
  0x4b   :  { %684 = vmatpush3.bf16.msra.mxu1 %v751_v7 }
  0x4c   :  { %685 = vmatprep.subr.bf16.mxu1 %v913_v0  ;;  %702 = vmatpush3.bf16.msra.mxu0 %v758_v47 }
  0x4d   :  { %703 = vmatprep.subr.bf16.mxu0 %v913_v0 }
  0x4f   :  { %686 = vmatpush3.bf16.msra.mxu1 %v752_v8 }
  0x50   :  { %687 = vmatprep.subr.bf16.mxu1 %v913_v0  ;;  %704 = vmatpush3.bf16.msra.mxu0 %v759_v48 }
  0x51   :  { %705 = vmatprep.subr.bf16.mxu0 %v913_v0 }
  0x53   :  { %688 = vmatpush3.bf16.msra.mxu1 %v753_v9 }
  0x54   :  { %689 = vmatprep.subr.bf16.mxu1 %v913_v0  ;;  %706 = vmatpush3.bf16.msra.mxu0 %v760_v49  ;;  %v446_v49 = vld [vmem:[%s1078_s8] sm:$0x1]  ;;  %s878_s8 = scalar_lea.vmem %s602_s17, 128 }
  0x55   :  { %707 = vmatprep.subr.bf16.mxu0 %v913_v0  ;;  %p879_p11 = scmp.ne.s32.totalorder %s602_s17, %s878_s8  ;;  %p884_p13 = scmp.lt.s32.totalorder %s878_s8, %s878_s8 }
  0x57   :  { %690 = vmatpush3.bf16.msra.mxu1 %v754_v10  ;;  %p885_p0 = por %p884_p13, %p883_p12 }
  0x58   :  { %691 = vmatprep.subr.bf16.mxu1 %v913_v0  ;;  %708 = vmatpush3.bf16.msra.mxu0 %v761_v50 }
  0x59   :  { %709 = vmatprep.subr.bf16.mxu0 %v913_v0  ;;  %p886_p1 = pnand %p885_p0, %p879_p11 }
  0x5b   :  { %692 = vmatpush3.bf16.msra.mxu1 %v755_v11  ;;  %v305_v11 = vld [vmem:[%s1075_s5] sm:$0x1] }
  0x5c   :  { %717 = vmatprep.subr.bf16.mxu1 %v913_v0  ;;  %710 = vmatpush3.bf16.msra.mxu0 %v762_v51 }
  0x5d   :  { %711 = vmatprep.subr.bf16.mxu0 %v913_v0 }
  0x60   :  { %712 = vmatpush3.bf16.msra.mxu0 %v763_v52 }
 0x102   :  { %v157_v12 = vpop.f32.mrf.mxu0 }
 0x103   :  { %v165_v13 = vrot.slane %v157_v12, 4 }
 0x104   :  { %v675_v14 = vpop.f32.mrf.mxu0 }
 0x105   :  { %v166_v15 = vadd.f32 %v165_v13, %v157_v12 }
 0x106   :  { %v160_v16 = vpop.f32.mrf.mxu0 }
 0x107   :  { %v167_v17 = vrot.slane %v166_v15, 2 }
 0x108   :  { %v676_v18 = vpop.f32.mrf.mxu0 }
 0x109   :  { %v168_v19 = vadd.f32 %v167_v17, %v166_v15  ;;  %v623_v15 = vld [vmem:[%s1076_s6] ss:$0 sm:$0xff] }
 0x10b   :  { %v169_v20 = vrot.slane %v168_v19, 1 }
 0x10d   :  { %v170_v21 = vadd.f32 %v169_v20, %v168_v19  ;;  %v764_v20 = vld [vmem:[#allocation10 + $0x38] sm:$0xff]  }
 0x10f   :  { %v172_v22 = vmul.f32 0.125, %v170_v21  ;;  %v765_v21 = vld [vmem:[#allocation10 + $0x30] sm:$0xff]  }
 0x111   :  { %v173_v23 = vsub.f32 %v157_v12, %v172_v22  ;;  %v766_v22 = vld [vmem:[#allocation10 + $0x28] sm:$0xff]  }
 0x113   :  { %v174_v24 = vmul.f32 %v173_v23, %v173_v23 }
 0x115   :  { %v175_v25 = vrot.slane %v174_v24, 4 }
 0x117   :  { %v176_v26 = vadd.f32 %v175_v25, %v174_v24  ;;  %v768_v24 = vld [vmem:[#allocation10 + $0x18] sm:$0xff]   ;;  %v769_v25 = vld [vmem:[#allocation10 + $0x10] sm:$0xff]  }
 0x119   :  { %v177_v27 = vrot.slane %v176_v26, 2 }
 0x11b   :  { %v178_v28 = vadd.f32 %v177_v27, %v176_v26  ;;  %v770_v26 = vld [vmem:[#allocation10 + $0x8] sm:$0xff]   ;;  %v771_v27 = vld [vmem:[#allocation10] sm:$0xff]  }
 0x11d   :  { %v179_v29 = vrot.slane %v178_v28, 1 }
 0x11f   :  { %v180_v30 = vadd.f32 %v179_v29, %v178_v28 }
 0x121   :  { %v181_v31 = vmul.f32 0.125, %v180_v30 }
 0x123   :  { %v182_v32 = vadd.f32 1e-05, %v181_v31 }
 0x125   :  { %772 = vrsqrt.f32 %v182_v32 }
 0x132   :  { %v773_v37 = vpop.eup %772 }
 0x133   :  { %v184_v38 = vmul.f32 %v773_v37, %v163_v35 }
 0x135   :  { %v189_v39 = vrot.slane %v184_v38, %v1028_v36 }
 0x137   :  { %v191_v41 = vmul.f32 %v189_v39, %v173_v23  ;;  %v767_v23 = vld [vmem:[#allocation10 + $0x20] sm:$0xff]  }
 0x139   :  { %v198_v42 = vadd.f32 %v614_v40, %v191_v41 }
 0x13b   :  { %v199_v43 = vmax.f32 %v198_v42, 0.0 }
 0x13d   :  { %v200_v44 = vpack.c.bf16 %v199_v43, %v199_v43 }
 0x13f   :  { %694 = vmatmul.mubr.bf16.vlgmr.msra.gmra.mxu1 %v200_v44 }
 0x140   :  { %733 = vmatprep.mubr.msk.bf16.mxu1 %vm914_vm0, %v913_v0  ;;  %718 = vmatpush3.bf16.msra.mxu1 %v764_v20 }
 0x141   :  { %719 = vmatprep.subr.bf16.mxu1 %v913_v0 }
 0x144   :  { %720 = vmatpush3.bf16.msra.mxu1 %v765_v21 }
 0x145   :  { %721 = vmatprep.subr.bf16.mxu1 %v913_v0 }
 0x148   :  { %722 = vmatpush3.bf16.msra.mxu1 %v766_v22 }
 0x149   :  { %723 = vmatprep.subr.bf16.mxu1 %v913_v0 }
 0x14c   :  { %724 = vmatpush3.bf16.msra.mxu1 %v767_v23 }
 0x14d   :  { %725 = vmatprep.subr.bf16.mxu1 %v913_v0 }
 0x150   :  { %726 = vmatpush3.bf16.msra.mxu1 %v768_v24 }
 0x151   :  { %727 = vmatprep.subr.bf16.mxu1 %v913_v0 }
 0x154   :  { %728 = vmatpush3.bf16.msra.mxu1 %v769_v25 }
 0x155   :  { %729 = vmatprep.subr.bf16.mxu1 %v913_v0 }
 0x158   :  { %730 = vmatpush3.bf16.msra.mxu1 %v770_v26 }
 0x159   :  { %731 = vmatprep.subr.bf16.mxu1 %v913_v0 }
 0x15c   :  { %732 = vmatpush3.bf16.msra.mxu1 %v771_v27 }
 0x1ff   :  { %v299_v53 = vpop.f32.mrf.mxu1 }
 0x200   :  { %v307_v54 = vrot.slane %v299_v53, 4 }
 0x201   :  { %v695_v55 = vpop.f32.mrf.mxu1 }
 0x202   :  { %v308_v56 = vadd.f32 %v307_v54, %v299_v53 }
 0x203   :  { %v302_v57 = vpop.f32.mrf.mxu1 }
 0x204   :  { %v309_v58 = vrot.slane %v308_v56, 2 }
 0x205   :  { %v696_v59 = vpop.f32.mrf.mxu1 }
 0x206   :  { %v310_v60 = vadd.f32 %v309_v58, %v308_v56  ;;  %v633_v58 = vld [vmem:[%s1081_s11] ss:$0 sm:$0xff] }
 0x208   :  { %v311_v61 = vrot.slane %v310_v60, 1 }
 0x20a   :  { %v312_v62 = vadd.f32 %v311_v61, %v310_v60 }
 0x20c   :  { %v313_v63 = vmul.f32 0.125, %v312_v62 }
 0x20e   :  { %v314_v1 = vsub.f32 %v299_v53, %v313_v63  ;;  %v632_v53 = vld [vmem:[%s1079_s9] ss:$0 sm:$0xff] }
 0x210   :  { %v315_v2 = vmul.f32 %v314_v1, %v314_v1 }
 0x212   :  { %v316_v3 = vrot.slane %v315_v2, 4 }
 0x214   :  { %v317_v4 = vadd.f32 %v316_v3, %v315_v2 }
 0x216   :  { %v318_v5 = vrot.slane %v317_v4, 2 }
 0x218   :  { %v319_v6 = vadd.f32 %v318_v5, %v317_v4 }
 0x21a   :  { %v320_v7 = vrot.slane %v319_v6, 1 }
 0x21c   :  { %v321_v8 = vadd.f32 %v320_v7, %v319_v6 }
 0x21e   :  { %v322_v9 = vmul.f32 0.125, %v321_v8 }
 0x220   :  { %v323_v10 = vadd.f32 1e-05, %v322_v9 }
 0x222   :  { %774 = vrsqrt.f32 %v323_v10 }
 0x22f   :  { %v775_v12 = vpop.eup %774 }
 0x230   :  { %v325_v13 = vmul.f32 %v775_v12, %v305_v11 }
 0x232   :  { %v330_v14 = vrot.slane %v325_v13, %v1028_v36 }
 0x234   :  { %v332_v16 = vmul.f32 %v330_v14, %v314_v1 }
 0x236   :  { %v339_v17 = vadd.f32 %v623_v15, %v332_v16 }
 0x238   :  { %v340_v18 = vmax.f32 %v339_v17, 0.0 }
 0x23a   :  { %v341_v19 = vpack.c.bf16 %v340_v18, %v340_v18 }
 0x23c   :  { %714 = vmatmul.mubr.bf16.vlgmr.msra.gmra.mxu0 %v341_v19 }
 0x2fc   :  { %v440_v28 = vpop.f32.mrf.mxu0 }
 0x2fd   :  { %v448_v29 = vrot.slane %v440_v28, 4 }
 0x2fe   :  { %v715_v30 = vpop.f32.mrf.mxu0 }
 0x2ff   :  { %v449_v31 = vadd.f32 %v448_v29, %v440_v28 }
 0x300   :  { %v443_v32 = vpop.f32.mrf.mxu0 }
 0x301   :  { %v450_v33 = vrot.slane %v449_v31, 2 }
 0x302   :  { %v716_v34 = vpop.f32.mrf.mxu0 }
 0x303   :  { %v451_v35 = vadd.f32 %v450_v33, %v449_v31 }
 0x305   :  { %v452_v37 = vrot.slane %v451_v35, 1 }
 0x307   :  { %v453_v38 = vadd.f32 %v452_v37, %v451_v35 }
 0x309   :  { %v454_v39 = vmul.f32 0.125, %v453_v38 }
 0x30b   :  { %v455_v40 = vsub.f32 %v440_v28, %v454_v39 }
 0x30d   :  { %v456_v41 = vmul.f32 %v455_v40, %v455_v40 }
 0x30f   :  { %v457_v42 = vrot.slane %v456_v41, 4 }
 0x311   :  { %v458_v43 = vadd.f32 %v457_v42, %v456_v41 }
 0x313   :  { %v459_v44 = vrot.slane %v458_v43, 2 }
 0x315   :  { %v460_v45 = vadd.f32 %v459_v44, %v458_v43 }
 0x317   :  { %v461_v0 = vrot.slane %v460_v45, 1 }
 0x319   :  { %v462_v46 = vadd.f32 %v461_v0, %v460_v45 }
 0x31b   :  { %v463_v47 = vmul.f32 0.125, %v462_v46 }
 0x31d   :  { %v464_v48 = vadd.f32 1e-05, %v463_v47 }
 0x31f   :  { %776 = vrsqrt.f32 %v464_v48 }
 0x32c   :  { %v777_v50 = vpop.eup %776 }
 0x32d   :  { %v466_v51 = vmul.f32 %v777_v50, %v446_v49 }
 0x32f   :  { %v471_v52 = vrot.slane %v466_v51, %v1028_v36 }
 0x331   :  { %v473_v54 = vmul.f32 %v471_v52, %v455_v40 }
 0x333   :  { %v480_v55 = vadd.f32 %v632_v53, %v473_v54 }
 0x335   :  { %v481_v56 = vmax.f32 %v480_v55, 0.0 }
 0x337   :  { %v482_v57 = vpack.c.bf16 %v481_v56, %v481_v56 }
 0x339   :  { %734 = vmatmul.mubr.bf16.vlgmr.msra.gmra.mxu1 %v482_v57 }
 0x3f9   :  { %v588_v59 = vpop.f32.mrf.mxu1 }
 0x3fa   :  { %v589_v60 = vadd.f32 %v633_v58, %v588_v59 }
 0x3fb   :  { %v735_v61 = vpop.f32.mrf.mxu1 }
 0x3fc   :  { %594 = vst [vmem:[#allocation11] sm:$0xff] %v589_v60 }
 0x3fd   :  { %v591_v36 = vpop.f32.mrf.mxu1 }
 0x3fe   :  { %889 = shalt.err (!%p886_p1)
}
 0x3ff   :  { %604 = dma.vmem_to_hbm [thread:$0]  %s602_s17, 128, %s1082_s12, [#allocation4]   ;;  %v736_v62 = vpop.f32.mrf.mxu1 }
 0x400   :  { %904 = dma.done.wait [#allocation4], 128  }
 0x401   :  { %905 = vsyncadd [#allocation4], 4294967168 }
 0x402   :  { %608 = vsyncpa [#allocation3], 1 }
 0x403   :  { %609 = vsyncpa [#allocation6], 1 }
 0x404   :  { %610 = vsyncpa [#allocation9], 1 }
 0x405   :  { %611 = vsyncpa [#allocation4], 1 }

</bundles_post_ra>
